<compile_context>
chip_gen: v7x
topology: tpu7x:2x2x1
jax: 0.10.0
libtpu: 0.0.40
codegen_flags: <defaults>
</compile_context>

<pallas_src>
import functools

import jax
import jax.numpy as jnp
from jax.experimental import pallas as pl
from jax.experimental.pallas import tpu as pltpu

BN_EPS = 1e-5
LANE = 128


def _round_up(x, m):
    return (x + m - 1) // m * m


# ---------------- Pass 1: conv matmul + global BN statistics -----------------
def conv_stats_kernel(patches_ref, w_ref, y_ref, sum_ref, ssq_ref):
    # Conv as matmul on the MXU: bf16 x bf16 -> f32 accumulate.
    y = jnp.dot(patches_ref[...], w_ref[...], preferred_element_type=jnp.float32)
    y_ref[...] = y

    # Zero the global per-channel accumulators on the first M tile.
    @pl.when(pl.program_id(0) == 0)
    def _():
        sum_ref[...] = jnp.zeros_like(sum_ref)
        ssq_ref[...] = jnp.zeros_like(ssq_ref)

    # Accumulate sum / sum-of-squares across all M tiles.
    # Zero-padded rows (M padding) produce y == 0, so they contribute nothing.
    sum_ref[...] += jnp.sum(y, axis=0, keepdims=True)
    ssq_ref[...] += jnp.sum(y * y, axis=0, keepdims=True)


# ---------------- Pass 2: fused BN affine + PReLU per M tile ------------------
def bn_prelu_kernel(m_total, y_ref, sum_ref, ssq_ref, gamma_ref, beta_ref,
                    alpha_ref, out_ref):
    inv_m = 1.0 / float(m_total)
    mean = sum_ref[...] * inv_m                       # (1, OUP_PAD)
    var = ssq_ref[...] * inv_m - mean * mean          # biased variance (training BN)
    scale = gamma_ref[...] * jax.lax.rsqrt(var + BN_EPS)
    bias = beta_ref[...] - mean * scale
    y = y_ref[...] * scale + bias                     # fused BN affine
    out_ref[...] = jnp.where(y > 0, y, alpha_ref[...] * y)  # per-channel PReLU


# ---------------- im2col (wrapper side, bf16) ---------------------------------
def im2col_bf16(x, k, s, p):
    """x: (N, C, H, W) f32 -> (N*Ho*Wo, C*k*k) bf16, plus Ho, Wo."""
    N, C, H, W = x.shape
    xp = jnp.pad(x.astype(jnp.bfloat16), ((0, 0), (0, 0), (p, p), (p, p)))
    Ho = (H + 2 * p - k) // s + 1
    Wo = (W + 2 * p - k) // s + 1
    taps = []
    for di in range(k):
        for dj in range(k):
            taps.append(xp[:, :, di:di + Ho * s:s, dj:dj + Wo * s:s])  # (N,C,Ho,Wo)
    cols = jnp.stack(taps, axis=2)                 # (N, C, k*k, Ho, Wo)
    cols = cols.reshape(N, C * k * k, Ho, Wo)      # channel-major, tap-offset inner
    cols = cols.transpose(0, 2, 3, 1).reshape(N * Ho * Wo, C * k * k)
    return cols, Ho, Wo


# ---------------- Wrapper ------------------------------------------------------
def conv_block_forward(x, weight, gamma, beta, alpha, *, k, s, p, tile_m=256):
    """x: (N, C, H, W).  weight: (oup, C, k, k).  Returns (N, oup, Ho, Wo) f32.

    tile_m: rows of the im2col matrix per grid step (multiple of 8).  256 is
    plenty for the toy shape; use 512-2048 for real shapes (halve on v7x,
    which has 64 MiB VMEM).
    """
    N, C, H, W = x.shape
    oup = weight.shape[0]
    oup_pad = _round_up(oup, LANE)

    patches, Ho, Wo = im2col_bf16(x, k, s, p)             # (M, K) bf16
    M, K = patches.shape
    tile_m = min(tile_m, _round_up(M, 8))
    m_pad = _round_up(M, tile_m)
    if m_pad != M:
        patches = jnp.pad(patches, ((0, m_pad - M), (0, 0)))
    grid_m = m_pad // tile_m

    # Weight as (K, oup) padded to 128 lanes, bf16 for the MXU.
    w2d = weight.astype(jnp.float32).reshape(oup, C * k * k).T.astype(jnp.bfloat16)
    w2d = jnp.pad(w2d, ((0, 0), (0, oup_pad - oup)))
    pad_c = ((0, 0), (0, oup_pad - oup))
    gamma2d = jnp.pad(gamma.astype(jnp.float32).reshape(1, oup), pad_c)
    beta2d = jnp.pad(beta.astype(jnp.float32).reshape(1, oup), pad_c)
    alpha2d = jnp.pad(alpha.astype(jnp.float32).reshape(1, oup), pad_c)

    # ---- Pass 1: streaming conv matmul + global sum / sum^2 accumulation ----
    y_raw, ch_sum, ch_ssq = pl.pallas_call(
        conv_stats_kernel,
        out_shape=(
            jax.ShapeDtypeStruct((m_pad, oup_pad), jnp.float32),
            jax.ShapeDtypeStruct((1, oup_pad), jnp.float32),
            jax.ShapeDtypeStruct((1, oup_pad), jnp.float32),
        ),
        grid=(grid_m,),
        in_specs=[
            pl.BlockSpec((tile_m, K), lambda i: (i, 0)),
            pl.BlockSpec((K, oup_pad), lambda i: (0, 0)),
        ],
        out_specs=(
            pl.BlockSpec((tile_m, oup_pad), lambda i: (i, 0)),
            pl.BlockSpec((1, oup_pad), lambda i: (0, 0)),
            pl.BlockSpec((1, oup_pad), lambda i: (0, 0)),
        ),
        compiler_params=pltpu.CompilerParams(
            dimension_semantics=("arbitrary",),       # stats are accumulated
            vmem_limit_bytes=32 * 1024 * 1024,
        ),
    )(patches, w2d)

    # ---- Pass 2: fused BN affine + PReLU, in place over y_raw ----
    kernel2 = functools.partial(bn_prelu_kernel, M)
    out2d = pl.pallas_call(
        kernel2,
        out_shape=jax.ShapeDtypeStruct((m_pad, oup_pad), jnp.float32),
        grid=(grid_m,),
        in_specs=[
            pl.BlockSpec((tile_m, oup_pad), lambda i: (i, 0)),
            pl.BlockSpec((1, oup_pad), lambda i: (0, 0)),
            pl.BlockSpec((1, oup_pad), lambda i: (0, 0)),
            pl.BlockSpec((1, oup_pad), lambda i: (0, 0)),
            pl.BlockSpec((1, oup_pad), lambda i: (0, 0)),
            pl.BlockSpec((1, oup_pad), lambda i: (0, 0)),
        ],
        out_specs=pl.BlockSpec((tile_m, oup_pad), lambda i: (i, 0)),
        input_output_aliases={0: 0},                  # normalize y_raw in place
        compiler_params=pltpu.CompilerParams(
            dimension_semantics=("parallel",),        # independent tiles (v7x 2-TC)
            vmem_limit_bytes=32 * 1024 * 1024,
        ),
    )(y_raw, ch_sum, ch_ssq, gamma2d, beta2d, alpha2d)

    out2d = out2d[:M, :oup]
    # (M, oup) -> (N, Ho, Wo, oup) -> NCHW (kept to match the PyTorch module).
    return out2d.reshape(N, Ho, Wo, oup).transpose(0, 3, 1, 2)


# ---------------- f32 reference (for sanity check) -----------------------------
def reference_conv_block(x, weight, gamma, beta, alpha, *, k, s, p):
    y = jax.lax.conv_general_dilated(
        x, weight, window_strides=(s, s), padding=[(p, p), (p, p)],
        dimension_numbers=("NCHW", "OIHW", "NCHW"))
    mean = jnp.mean(y, axis=(0, 2, 3), keepdims=True)
    var = jnp.mean((y - mean) ** 2, axis=(0, 2, 3), keepdims=True)
    yh = (y - mean) * jax.lax.rsqrt(var + BN_EPS)
    yb = yh * gamma.reshape(1, -1, 1, 1) + beta.reshape(1, -1, 1, 1)
    return jnp.where(yb > 0, yb, alpha.reshape(1, -1, 1, 1) * yb)


if __name__ == "__main__":
    # ConvBlock(inp=4, oup=8, k=3, s=1, p=1, dw=False, linear=False)
    N, inp, H, W = 2, 4, 16, 16
    oup, k, s, p = 8, 3, 1, 1

    key = jax.random.PRNGKey(0)
    kx, kw, kg, kb = jax.random.split(key, 4)

    x = jax.random.normal(kx, (N, inp, H, W), dtype=jnp.float32)
    weight = jax.random.normal(kw, (oup, inp, k, k), dtype=jnp.float32) * 0.1
    gamma = 1.0 + 0.1 * jax.random.normal(kg, (oup,), dtype=jnp.float32)   # BN weight
    beta = 0.1 * jax.random.normal(kb, (oup,), dtype=jnp.float32)          # BN bias
    alpha = jnp.full((oup,), 0.25, dtype=jnp.float32)                      # PReLU init

    out = conv_block_forward(x, weight, gamma, beta, alpha, k=k, s=s, p=p)
    out = jax.block_until_ready(out)
    assert out.shape == (N, oup, H, W)

    # Sanity vs f32 reference (kernel uses bf16 MXU inputs -> loose tolerance).
    ref = reference_conv_block(x, weight, gamma, beta, alpha, k=k, s=s, p=p)
    err = float(jnp.max(jnp.abs(out - ref)))
    assert err < 0.1, f"max abs err {err}"
    print("KERNEL_OK")
</pallas_src>

<mosaic_0001>
module attributes {stable_mosaic.version = 11 : i64} {
  func.func @conv_stats_kernel(%arg0: i32, %arg1: memref<256x36xbf16, #tpu.memory_space<vmem>>, %arg2: memref<36x128xbf16, #tpu.memory_space<vmem>>, %arg3: memref<256x128xf32, #tpu.memory_space<vmem>>, %arg4: memref<1x128xf32, #tpu.memory_space<vmem>>, %arg5: memref<1x128xf32, #tpu.memory_space<vmem>>) attributes {dimension_semantics = [#tpu.dimension_semantics<arbitrary>], iteration_bounds = array<i64: 2>, scalar_prefetch = 0 : i64, scratch_operands = 0 : i64, tpu.core_type = #tpu.core_type<tc>, window_params = [{transform_indices = @transform_0, window_bounds = array<i64: 256, 36>}, {pipeline_mode = #tpu.pipeline_mode<synchronous>, transform_indices = @transform_1, window_bounds = array<i64: 36, 128>}, {transform_indices = @transform_2, window_bounds = array<i64: 256, 128>}, {pipeline_mode = #tpu.pipeline_mode<synchronous>, transform_indices = @transform_3, window_bounds = array<i64: 1, 128>}, {pipeline_mode = #tpu.pipeline_mode<synchronous>, transform_indices = @transform_4, window_bounds = array<i64: 1, 128>}]} {
    %c0 = arith.constant 0 : index
    %c0_0 = arith.constant 0 : index
    %0 = vector.load %arg1[%c0, %c0_0] : memref<256x36xbf16, #tpu.memory_space<vmem>>, vector<256x36xbf16>
    %c0_1 = arith.constant 0 : index
    %c0_2 = arith.constant 0 : index
    %1 = vector.load %arg2[%c0_1, %c0_2] : memref<36x128xbf16, #tpu.memory_space<vmem>>, vector<36x128xbf16>
    %cst = arith.constant dense<0.000000e+00> : vector<256x128xf32>
    %2 = tpu.matmul %0, %1, %cst {dimension_numbers = #tpu.dot_dimension_numbers<[1], [0], [0], [1], [0, 0, 1, 1], [], []>} : vector<256x36xbf16>, vector<36x128xbf16>, vector<256x128xf32> -> vector<256x128xf32>
    %c0_3 = arith.constant 0 : index
    %c0_4 = arith.constant 0 : index
    %3 = vector.load %arg3[%c0_3, %c0_4] : memref<256x128xf32, #tpu.memory_space<vmem>>, vector<256x128xf32>
    tpu.vector_store %arg3[%c0_3, %c0_4], %2 {strides = array<i32>} : memref<256x128xf32, #tpu.memory_space<vmem>>, vector<256x128xf32>,
    %c0_i32 = arith.constant 0 : i32
    %4 = arith.cmpi eq, %arg0, %c0_i32 : i32
    %5 = arith.extui %4 : i1 to i32
    %c0_i32_5 = arith.constant 0 : i32
    %6 = arith.cmpi ne, %5, %c0_i32_5 : i32
    scf.if %6 {
      %cst_16 = arith.constant 0.000000e+00 : f32
      %18 = vector.broadcast %cst_16 : f32 to vector<1x128xf32>
      %c0_17 = arith.constant 0 : index
      %c0_18 = arith.constant 0 : index
      %19 = vector.load %arg4[%c0_17, %c0_18] : memref<1x128xf32, #tpu.memory_space<vmem>>, vector<1x128xf32>
      tpu.vector_store %arg4[%c0_17, %c0_18], %18 {strides = array<i32>} : memref<1x128xf32, #tpu.memory_space<vmem>>, vector<1x128xf32>,
      %cst_19 = arith.constant 0.000000e+00 : f32
      %20 = vector.broadcast %cst_19 : f32 to vector<1x128xf32>
      %c0_20 = arith.constant 0 : index
      %c0_21 = arith.constant 0 : index
      %21 = vector.load %arg5[%c0_20, %c0_21] : memref<1x128xf32, #tpu.memory_space<vmem>>, vector<1x128xf32>
      tpu.vector_store %arg5[%c0_20, %c0_21], %20 {strides = array<i32>} : memref<1x128xf32, #tpu.memory_space<vmem>>, vector<1x128xf32>,
    } else {
    }
    %c0_6 = arith.constant 0 : index
    %c0_7 = arith.constant 0 : index
    %7 = vector.load %arg4[%c0_6, %c0_7] : memref<1x128xf32, #tpu.memory_space<vmem>>, vector<1x128xf32>
    %cst_8 = arith.constant dense<0.000000e+00> : vector<128xf32>
    %8 = vector.multi_reduction <add>, %2, %cst_8 [0] : vector<256x128xf32> to vector<128xf32>
    %9 = vector.shape_cast %8 : vector<128xf32> to vector<1x128xf32>
    %10 = arith.addf %7, %9 : vector<1x128xf32>
    %c0_9 = arith.constant 0 : index
    %c0_10 = arith.constant 0 : index
    %11 = vector.load %arg4[%c0_9, %c0_10] : memref<1x128xf32, #tpu.memory_space<vmem>>, vector<1x128xf32>
    tpu.vector_store %arg4[%c0_9, %c0_10], %10 {strides = array<i32>} : memref<1x128xf32, #tpu.memory_space<vmem>>, vector<1x128xf32>,
    %c0_11 = arith.constant 0 : index
    %c0_12 = arith.constant 0 : index
    %12 = vector.load %arg5[%c0_11, %c0_12] : memref<1x128xf32, #tpu.memory_space<vmem>>, vector<1x128xf32>
    %13 = arith.mulf %2, %2 : vector<256x128xf32>
    %cst_13 = arith.constant dense<0.000000e+00> : vector<128xf32>
    %14 = vector.multi_reduction <add>, %13, %cst_13 [0] : vector<256x128xf32> to vector<128xf32>
    %15 = vector.shape_cast %14 : vector<128xf32> to vector<1x128xf32>
    %16 = arith.addf %12, %15 : vector<1x128xf32>
    %c0_14 = arith.constant 0 : index
    %c0_15 = arith.constant 0 : index
    %17 = vector.load %arg5[%c0_14, %c0_15] : memref<1x128xf32, #tpu.memory_space<vmem>>, vector<1x128xf32>
    tpu.vector_store %arg5[%c0_14, %c0_15], %16 {strides = array<i32>} : memref<1x128xf32, #tpu.memory_space<vmem>>, vector<1x128xf32>,
    return
  }
  func.func @transform_0(%arg0: i32) -> (i32, i32) {
    %c0_i32 = arith.constant 0 : i32
    %c0_i32_0 = arith.constant 0 : i32
    return %arg0, %c0_i32 : i32, i32
  }
  func.func @transform_1(%arg0: i32) -> (i32, i32) {
    %c0_i32 = arith.constant 0 : i32
    %c0_i32_0 = arith.constant 0 : i32
    %c0_i32_1 = arith.constant 0 : i32
    return %c0_i32, %c0_i32_0 : i32, i32
  }
  func.func @transform_2(%arg0: i32) -> (i32, i32) {
    %c0_i32 = arith.constant 0 : i32
    %c0_i32_0 = arith.constant 0 : i32
    return %arg0, %c0_i32 : i32, i32
  }
  func.func @transform_3(%arg0: i32) -> (i32, i32) {
    %c0_i32 = arith.constant 0 : i32
    %c0_i32_0 = arith.constant 0 : i32
    %c0_i32_1 = arith.constant 0 : i32
    return %c0_i32, %c0_i32_0 : i32, i32
  }
  func.func @transform_4(%arg0: i32) -> (i32, i32) {
    %c0_i32 = arith.constant 0 : i32
    %c0_i32_0 = arith.constant 0 : i32
    %c0_i32_1 = arith.constant 0 : i32
    return %c0_i32, %c0_i32_0 : i32, i32
  }
}

</mosaic_0001>

<bundles_post_ra>
// kernel: tpu_custom_call.1
= control target key start
LH: loop header
LB: loop body
LE: loop exit
PB: predicated region body
PF: predicated region fallthrough
CT: control target
= control target key end

     0   :  { %10 = vsyncpa [#allocation3], 0  ;;  %s1574_s0 = inlined_call_operand.vmem [shape: bf16[512,36], index: 0, kind: input, shape index: {}]   ;;  %s1575_s1 = inlined_call_operand.vmem [shape: bf16[36,128], index: 1, kind: input, shape index: {}]   ;;  %s1576_s2 = inlined_call_operand.hbm [shape: f32[512,128], index: 2, kind: output, shape index: {0}]   ;;  %s1577_s3 = inlined_call_operand.hbm [shape: f32[1,128], index: 3, kind: output, shape index: {1}]   ;;  %s1578_s4 = inlined_call_operand.hbm [shape: f32[1,128], index: 4, kind: output, shape index: {2}]  }
   0x1   :  { %12 = vsyncpa [#allocation3 + $0x1], 0 }
   0x2   :  { %13 = vsyncpa [#allocation5], 0  ;;  %s1155_s15 = smov 0   ;;  %s1157_s16 = smov 0  }
   0x3   :  { %s1159_s17 = smov 0   ;;  %s1161_s18 = smov 0  }
   0x4 LB: > { %s1176_s19 = sadd.s32 4294967295, %s1122_s18   ;;  %s811_s20 = sadd.s32 4294967294, %s1122_s18   ;;  %s1122_s18 = sphi %s1161_s18, %s1584_s18   ;;  %s1118_s17 = sphi %s1159_s17, %s1583_s17   ;;  %s1114_s16 = sphi %s1157_s16, %s1582_s16   ;;  %s1110_s15 = sphi %s1155_s15, %s1581_s15  }
   0x5   : > { %s1180_s21 = sadd.s32 1, %s1122_s18   ;;  %s73_s22 = sadd.s32 1, %s1118_s17 }
   0x6   : > { %s70_s23 = ssub.s32 %s1122_s18, %s1180_s21  ;;  %p83_p0 = scmp.ne.s32.totalorder %s1118_s17, %s1114_s16 }
   0x7   : > { %p71_p1 = scmp.eq.s32.totalorder %s70_s23, 0  ;;  %p84_p2 = scmp.eq.s32.totalorder %s1176_s19, 1 }
   0x8   : > { %p89_p3 = scmp.ne.s32.totalorder %s1114_s16, %s1110_s15  ;;  %p90_p4 = scmp.eq.s32.totalorder %s811_s20, 1 }
   0x9   : > { %s1191_s24 = scalar_select %p71_p1, %s1118_s17, %s73_s22  }
   0xa   : > { %p1195_p5 = por %p84_p2, %p83_p0  ;;  %p1199_p6 = por %p90_p4, %p89_p3 }
   0xb   : > { %p814_p7 = scmp.ge.s32.totalorder %s1122_s18, 1  ;;  %p162_p8 = scmp.lt.s32.totalorder %s1122_s18, 3 }
   0xd   : > { %p163_p9 = pnand %p814_p7, %p162_p8 }
   0xe   : > { %v985_v0 = vld [vmem:[%s1575_s1] sm:$0xff] (!%p163_p9)   ;;  %v986_v1 = vld [vmem:[%s1575_s1 + $0x8] sm:$0xff] (!%p163_p9)   ;;  %s816_s5 = sshll.u32 (!%p163_p9), %s1176_s19, 5  ;;  %v987_v2 = vld [vmem:[%s1575_s1 + $0x10] ss:$0 sps:$4 sm:$0x33] (!%p163_p9)  }
   0xf   : > { %166 = sbr.rel (%p163_p9) target bundleno = 397 (0x18d), region = 28  ;;  %883 = vmatprep.subr.bf16.mxu0 (!%p163_p9), %v985_v0  ;;  %921 = vmatprep.subr.bf16.mxu1 (!%p163_p9), %v985_v0  ;;  %p189_p10 = scmp.lt.s32.totalorder (!%p163_p9), %s816_s5, 63  ;;  %vm377_vm0 = vcmask (!%p163_p9), 1041408   ;;  %vm328_vm1 = vcmask (!%p163_p9), 293888  }
  0x10   : > { %884 = vmatpush3.bf16.msra.mxu0 (!%p163_p9), %v985_v0  ;;  %924 = vmatpush3.bf16.msra.mxu1 (!%p163_p9), %v985_v0  ;;  %v379_v3 = vsel (!%p163_p9), %vm377_vm0, %v987_v2, 0  ;;  %s181_s12 = sand.u32 (!%p163_p9), 1, %s1114_s16   ;;  %p853_p11 = scmp.ne.s32.totalorder (!%p163_p9), %s1176_s19, 0 }
  0x11   : > { %885 = vmatprep.subr.bf16.mxu0 (!%p163_p9), %v986_v1  ;;  %922 = vmatprep.subr.bf16.mxu1 (!%p163_p9), %v986_v1  ;;  %s815_s13 = sshll.u32 (!%p163_p9), %s181_s12, 8 }
  0x12   : > { %s1259_s14 = scalar_lea.vmem (!%p163_p9), [#allocation2], %s815_s13 }
  0x14   : > { %886 = vmatpush3.bf16.msra.mxu0 (!%p163_p9), %v986_v1  ;;  %925 = vmatpush3.bf16.msra.mxu1 (!%p163_p9), %v986_v1 }
  0x15   : > { %927 = vmatprep.subr.msk.bf16.mxu0 (!%p163_p9), %vm377_vm0, %v987_v2  ;;  %928 = vmatprep.subr.msk.bf16.mxu1 (!%p163_p9), %vm377_vm0, %v987_v2 }
  0x16   : > { %s1586_s5 = smov (!%p189_p10, %s816_s5), 63  ;;  %v1124_v52 = vmov (!%p853_p11), 0.0  }
  0x17   : > { %s817_s8 = sshll.u32 %s1586_s5, 2  ;;  %578 = vst [vmem:[#allocation4] sm:$0x1] (!%p853_p11), %v1124_v52  ;;  %579 = vst [vmem:[#allocation6] sm:$0x1] (!%p853_p11), %v1124_v52 }
  0x18   : > { %s1218_s11 = scalar_lea.vmem %s1574_s0, %s817_s8  ;;  %888 = vmatpush3.bf16.msra.mxu0 %v379_v3  ;;  %926 = vmatpush3.bf16.msra.mxu1 %v379_v3 }
  0x19   : > { %v988_v4 = vld [vmem:[%s1218_s11] sm:$0xff]   ;;  %v990_v6 = vld [vmem:[%s1218_s11 + $0x8] sm:$0xff]   ;;  %v992_v8 = vld [vmem:[%s1218_s11 + $0x10] sm:$0xff]  }
  0x1a   : > { %v989_v5 = vld [vmem:[%s1218_s11 + $0x40] sm:$0xff]   ;;  %889 = vmatprep.mubr.msk.bf16.mxu0 %vm328_vm1, %v988_v4  ;;  %v991_v7 = vld [vmem:[%s1218_s11 + $0x48] sm:$0xff]   ;;  %v993_v9 = vld [vmem:[%s1218_s11 + $0x50] sm:$0xff]  }
  0x1b   : > { %905 = vmatprep.mubr.msk.bf16.mxu1 %vm328_vm1, %v989_v5  ;;  %890 = vmatmul.mubr.msk.bf16.vlgmr.msra.gmra.mrb[0].mxu0 %vm328_vm1, %v990_v6  ;;  %v994_v10 = vld [vmem:[%s1218_s11 + $0x18] sm:$0xff]   ;;  %v996_v12 = vld [vmem:[%s1218_s11 + $0x20] sm:$0xff]   ;;  %v998_v14 = vld [vmem:[%s1218_s11 + $0x28] sm:$0xff]  }
  0x1c   : > { %906 = vmatmul.mubr.msk.bf16.vlgmr.msra.gmra.mrb[0].mxu1 %vm328_vm1, %v991_v7  ;;  %893 = vmatprep.mubr.msk.bf16.mxu0 %vm328_vm1, %v992_v8  ;;  %v995_v11 = vld [vmem:[%s1218_s11 + $0x58] sm:$0xff]   ;;  %v997_v13 = vld [vmem:[%s1218_s11 + $0x60] sm:$0xff]   ;;  %v999_v15 = vld [vmem:[%s1218_s11 + $0x68] sm:$0xff]  }
  0x1d   : > { %909 = vmatprep.mubr.msk.bf16.mxu1 %vm328_vm1, %v993_v9  ;;  %v1000_v16 = vld [vmem:[%s1218_s11 + $0x30] sm:$0xff]   ;;  %v1002_v18 = vld [vmem:[%s1218_s11 + $0x38] sm:$0xff]  }
  0x1e   : > { %v1001_v17 = vld [vmem:[%s1218_s11 + $0x70] sm:$0xff]   ;;  %v1003_v19 = vld [vmem:[%s1218_s11 + $0x78] sm:$0xff]  }
  0x23   : > { %894 = vmatmul.mubr.msk.bf16.gmra.mrb[4].mxu0 %vm328_vm1, %v994_v10 }
  0x24   : > { %910 = vmatmul.mubr.msk.bf16.gmra.mrb[4].mxu1 %vm328_vm1, %v995_v11  ;;  %897 = vmatprep.mubr.msk.bf16.mxu0 %vm328_vm1, %v996_v12 }
  0x25   : > { %913 = vmatprep.mubr.msk.bf16.mxu1 %vm328_vm1, %v997_v13 }
  0x2b   : > { %898 = vmatmul.mubr.msk.bf16.gmra.mrb[8].mxu0 %vm328_vm1, %v998_v14 }
  0x2c   : > { %914 = vmatmul.mubr.msk.bf16.gmra.mrb[8].mxu1 %vm328_vm1, %v999_v15  ;;  %901 = vmatprep.mubr.msk.bf16.mxu0 %vm328_vm1, %v1000_v16 }
  0x2d   : > { %917 = vmatprep.mubr.msk.bf16.mxu1 %vm328_vm1, %v1001_v17 }
  0x33   : > { %902 = vmatmul.mubr.msk.bf16.gmra.mrb[12].mxu0 %vm328_vm1, %v1002_v18 }
  0x34   : > { %918 = vmatmul.mubr.msk.bf16.gmra.mrb[12].mxu1 %vm328_vm1, %v1003_v19 }
  0xee   : > { %v1255_v20 = vpop.f32.mrb[0].mxu0 }
  0xef   : > { %v1257_v21 = vpop.f32.mrb[0].mxu1  ;;  %544 = vst [vmem:[%s1259_s14 + $0x10] sm:$0xff] %v1255_v20  ;;  %v1265_v22 = vpop.f32.mrb[1].mxu0 }
  0xf0   : > { %560 = vst [vmem:[%s1259_s14 + $0x90] sm:$0xff] %v1257_v21  ;;  %v1267_v23 = vpop.f32.mrb[1].mxu1  ;;  %542 = vst [vmem:[%s1259_s14] sm:$0xff] %v1265_v22  ;;  %v1273_v24 = vpop.f32.mrb[2].mxu0 }
  0xf1   : > { %558 = vst [vmem:[%s1259_s14 + $0x80] sm:$0xff] %v1267_v23  ;;  %v1275_v25 = vpop.f32.mrb[2].mxu1  ;;  %545 = vst [vmem:[%s1259_s14 + $0x18] sm:$0xff] %v1273_v24  ;;  %v1281_v26 = vpop.f32.mrb[3].mxu0 }
  0xf2   : > { %561 = vst [vmem:[%s1259_s14 + $0x98] sm:$0xff] %v1275_v25  ;;  %v1283_v27 = vpop.f32.mrb[3].mxu1  ;;  %543 = vst [vmem:[%s1259_s14 + $0x8] sm:$0xff] %v1281_v26 }
  0xf3   : > { %559 = vst [vmem:[%s1259_s14 + $0x88] sm:$0xff] %v1283_v27 }
  0xf6   : > { %v1289_v28 = vpop.f32.mrb[4].mxu0 }
  0xf7   : > { %v1291_v29 = vpop.f32.mrb[4].mxu1  ;;  %548 = vst [vmem:[%s1259_s14 + $0x30] sm:$0xff] %v1289_v28  ;;  %v1297_v30 = vpop.f32.mrb[5].mxu0 }
  0xf8   : > { %564 = vst [vmem:[%s1259_s14 + $0xb0] sm:$0xff] %v1291_v29  ;;  %v1299_v31 = vpop.f32.mrb[5].mxu1  ;;  %546 = vst [vmem:[%s1259_s14 + $0x20] sm:$0xff] %v1297_v30  ;;  %v1305_v32 = vpop.f32.mrb[6].mxu0 }
  0xf9   : > { %562 = vst [vmem:[%s1259_s14 + $0xa0] sm:$0xff] %v1299_v31  ;;  %v1307_v33 = vpop.f32.mrb[6].mxu1  ;;  %549 = vst [vmem:[%s1259_s14 + $0x38] sm:$0xff] %v1305_v32  ;;  %v1313_v34 = vpop.f32.mrb[7].mxu0 }
  0xfa   : > { %565 = vst [vmem:[%s1259_s14 + $0xb8] sm:$0xff] %v1307_v33  ;;  %v1315_v35 = vpop.f32.mrb[7].mxu1  ;;  %547 = vst [vmem:[%s1259_s14 + $0x28] sm:$0xff] %v1313_v34 }
  0xfb   : > { %563 = vst [vmem:[%s1259_s14 + $0xa8] sm:$0xff] %v1315_v35 }
  0xfe   : > { %v1321_v36 = vpop.f32.mrb[8].mxu0 }
  0xff   : > { %v1323_v37 = vpop.f32.mrb[8].mxu1  ;;  %552 = vst [vmem:[%s1259_s14 + $0x50] sm:$0xff] %v1321_v36  ;;  %v1329_v38 = vpop.f32.mrb[9].mxu0 }
 0x100   : > { %568 = vst [vmem:[%s1259_s14 + $0xd0] sm:$0xff] %v1323_v37  ;;  %v1331_v39 = vpop.f32.mrb[9].mxu1  ;;  %550 = vst [vmem:[%s1259_s14 + $0x40] sm:$0xff] %v1329_v38  ;;  %v1337_v40 = vpop.f32.mrb[10].mxu0 }
 0x101   : > { %566 = vst [vmem:[%s1259_s14 + $0xc0] sm:$0xff] %v1331_v39  ;;  %v1339_v41 = vpop.f32.mrb[10].mxu1  ;;  %553 = vst [vmem:[%s1259_s14 + $0x58] sm:$0xff] %v1337_v40  ;;  %v1345_v42 = vpop.f32.mrb[11].mxu0 }
 0x102   : > { %569 = vst [vmem:[%s1259_s14 + $0xd8] sm:$0xff] %v1339_v41  ;;  %v1347_v43 = vpop.f32.mrb[11].mxu1  ;;  %551 = vst [vmem:[%s1259_s14 + $0x48] sm:$0xff] %v1345_v42 }
 0x103   : > { %567 = vst [vmem:[%s1259_s14 + $0xc8] sm:$0xff] %v1347_v43 }
 0x105   : > { %577 = sbr.rel (%p853_p11) target bundleno = 268 (0x10c), region = 32 }
 0x106   : > { %v1353_v44 = vpop.f32.mrb[12].mxu0 }
 0x107   : > { %v1355_v45 = vpop.f32.mrb[12].mxu1  ;;  %556 = vst [vmem:[%s1259_s14 + $0x70] sm:$0xff] %v1353_v44  ;;  %v1361_v46 = vpop.f32.mrb[13].mxu0 }
 0x108   : > { %572 = vst [vmem:[%s1259_s14 + $0xf0] sm:$0xff] %v1355_v45  ;;  %v1363_v47 = vpop.f32.mrb[13].mxu1  ;;  %554 = vst [vmem:[%s1259_s14 + $0x60] sm:$0xff] %v1361_v46  ;;  %v1369_v48 = vpop.f32.mrb[14].mxu0 }
 0x109   : > { %570 = vst [vmem:[%s1259_s14 + $0xe0] sm:$0xff] %v1363_v47  ;;  %v1371_v49 = vpop.f32.mrb[14].mxu1  ;;  %557 = vst [vmem:[%s1259_s14 + $0x78] sm:$0xff] %v1369_v48  ;;  %v1377_v50 = vpop.f32.mrb[15].mxu0 }
 0x10a   : > { %573 = vst [vmem:[%s1259_s14 + $0xf8] sm:$0xff] %v1371_v49  ;;  %v1379_v51 = vpop.f32.mrb[15].mxu1  ;;  %555 = vst [vmem:[%s1259_s14 + $0x68] sm:$0xff] %v1377_v50 }
 0x10b   : > { %571 = vst [vmem:[%s1259_s14 + $0xe8] sm:$0xff] %v1379_v51 }
 0x10c PF: > { %v581_v53 = vadd.f32 %v1281_v26, %v1265_v22  ;;  %s863_s20 = sshll.u32 %s1176_s19, 12  ;;  %s706_s28 = sshll.u32 %s1259_s14, 4  ;;  %v621_v56 = vmul.f32 %v1265_v22, %v1265_v22  ;;  %v622_v57 = vmul.f32 %v1281_v26, %v1281_v26  ;;  %s1397_s28 = int_to_ptr.vmem [resolvable:$true] %s706_s28 }
 0x10d   : > { %s1393_s27 = scalar_lea.hbm %s1576_s2, %s863_s20  ;;  %s1406_s29 = scalar_lea.sflag [#allocation3], %s181_s12 }
 0x10e   : > { %v582_v54 = vadd.f32 %v1255_v20, %v581_v53  ;;  %s1004_s30 = scalar_lea.vmem %s1397_s28, 4096  ;;  %s1125_s5 = smov [#allocation2]  }
 0x10f   : > { %p1005_p12 = scmp.ne.s32.totalorder %s1397_s28, %s1004_s30  ;;  %s1008_s6 = sshll.u32 %s1125_s5, 4  ;;  %s1009_s6 = int_to_ptr.vmem [resolvable:$false] %s1008_s6 }
 0x110   : > { %v583_v55 = vadd.f32 %v1273_v24, %v582_v54  ;;  %s1010_s7 = scalar_lea.vmem %s1009_s6, 8192  ;;  %p1011_p1 = scmp.lt.s32.totalorder %s1397_s28, %s1009_s6 }
 0x111   : > { %p1006_p13 = pnand %p1005_p12, %p1195_p5  ;;  %p1012_p3 = scmp.lt.s32.totalorder %s1010_s7, %s1004_s30 }
 0x112   : > { %v584_v58 = vadd.f32 %v583_v55, %v1297_v30 }
 0x113   : > { %p1007_p0 = pneg %p1006_p13  ;;  %p1013_p4 = por %p1012_p3, %p1011_p1 }
 0x115   : > { %p1014_p7 = pnand %p1013_p4, %p1007_p0 }
 0x117   : > { %1017 = shalt.err (!%p1014_p7)
}
 0x118   : > { %s1018_s8 = scalar_lea.hbm %s1393_s27, 4096  ;;  %s1022_s11 = scalar_lea.hbm %s1576_s2, 8192 }
 0x119   : > { %p1019_p8 = scmp.ne.s32.totalorder %s1393_s27, %s1018_s8  ;;  %p1023_p11 = scmp.lt.u32.totalorder %s1393_s27, %s1576_s2 }
 0x11a   : > { %p1024_p12 = scmp.lt.u32.totalorder %s1022_s11, %s1018_s8  ;;  %p1026_p0 = scmp.lt.u32.totalorder %s1018_s8, %s1393_s27 }
 0x11b   : > { %p1020_p9 = pnand %p1019_p8, %p1195_p5 }
 0x11c   : > { %p1025_p13 = por %p1024_p12, %p1023_p11 }
 0x11d   : > { %p1021_p10 = pneg %p1020_p9 }
 0x11e   : > { %p1027_p1 = por %p1026_p0, %p1025_p13 }
 0x120   : > { %p1028_p3 = pnand %p1027_p1, %p1021_p10 }
 0x122   : > { %1031 = shalt.err (!%p1028_p3)
}
 0x123   : > { %s1126_s14 = smov 128   ;;  %s1127_s20 = smov 8   ;;  %v623_v59 = vmul.f32 %v1255_v20, %v1255_v20  ;;  %v585_v60 = vadd.f32 %v584_v58, %v1313_v34  ;;  %v624_v61 = vmul.f32 %v1273_v24, %v1273_v24  ;;  %v653_v62 = vadd.f32 %v622_v57, %v621_v56 }
 0x124   : > { %929 = dma.vmem_to_hbm [thread:$0]  (%p1195_p5), %s1397_s28, 4096, %s1393_s27, %s1406_s29, %s1126_s14, %s1126_s14, %s1127_s20   ;;  %v625_v0 = vmul.f32 %v1297_v30, %v1297_v30  ;;  %v626_v3 = vmul.f32 %v1313_v34, %v1313_v34  ;;  %v627_v6 = vmul.f32 %v1289_v28, %v1289_v28  ;;  %v628_v9 = vmul.f32 %v1305_v32, %v1305_v32 }
 0x125   : > { %v586_v63 = vadd.f32 %v1289_v28, %v585_v60  ;;  %v654_v1 = vadd.f32 %v653_v62, %v623_v59  ;;  %v629_v12 = vmul.f32 %v1329_v38, %v1329_v38  ;;  %v630_v15 = vmul.f32 %v1345_v42, %v1345_v42  ;;  %s1128_s25 = smov [#allocation4]  }
 0x126   : > { %v631_v18 = vmul.f32 %v1321_v36, %v1321_v36  ;;  %v632_v22 = vmul.f32 %v1337_v40, %v1337_v40  ;;  %v633_v28 = vmul.f32 %v1361_v46, %v1361_v46  ;;  %v634_v34 = vmul.f32 %v1377_v50, %v1377_v50  ;;  %s720_s22 = sshll.u32 %s1128_s25, 4  ;;  %s721_s22 = int_to_ptr.vmem [resolvable:$true] %s720_s22 }
 0x127   : > { %v587_v2 = vadd.f32 %v1305_v32, %v586_v63  ;;  %v655_v4 = vadd.f32 %v654_v1, %v624_v61  ;;  %v636_v53 = vmul.f32 %v1369_v48, %v1369_v48  ;;  %v637_v55 = vmul.f32 %v1267_v23, %v1267_v23  ;;  %s1032_s23 = scalar_lea.vmem %s721_s22, 16  ;;  %s1038_s27 = scalar_lea.vmem %s721_s22, 32 }
 0x128   : > { %v638_v57 = vmul.f32 %v1283_v27, %v1283_v27  ;;  %v639_v59 = vmul.f32 %v1257_v21, %v1257_v21  ;;  %v640_v61 = vmul.f32 %v1275_v25, %v1275_v25  ;;  %v641_v63 = vmul.f32 %v1299_v31, %v1299_v31  ;;  %p1033_p5 = scmp.ne.s32.totalorder %s721_s22, %s1032_s23  ;;  %p1039_p8 = scmp.lt.s32.totalorder %s721_s22, %s721_s22 }
 0x129   : > { %v588_v5 = vadd.f32 %v587_v2, %v1329_v38  ;;  %v656_v7 = vadd.f32 %v655_v4, %v625_v0  ;;  %v642_v1 = vmul.f32 %v1315_v35, %v1315_v35  ;;  %p1040_p9 = scmp.lt.s32.totalorder %s1038_s27, %s1032_s23 }
 0x12a   : > { %p1034_p4 = pnand %p1033_p5, %p84_p2 }
 0x12b   : > { %v589_v8 = vadd.f32 %v588_v5, %v1345_v42  ;;  %v657_v10 = vadd.f32 %v656_v7, %v626_v3  ;;  %v635_v42 = vmul.f32 %v1353_v44, %v1353_v44  ;;  %v643_v3 = vmul.f32 %v1291_v29, %v1291_v29  ;;  %p1041_p10 = por %p1040_p9, %p1039_p8 }
 0x12c   : > { %v644_v5 = vmul.f32 %v1307_v33, %v1307_v33  ;;  %v645_v7 = vmul.f32 %v1331_v39, %v1331_v39  ;;  %p1035_p7 = pneg %p1034_p4 }
 0x12d   : > { %v590_v11 = vadd.f32 %v1321_v36, %v589_v8  ;;  %v658_v13 = vadd.f32 %v657_v10, %v627_v6 }
 0x12e   : > { %p1042_p11 = pnand %p1041_p10, %p1035_p7 }
 0x12f   : > { %v591_v14 = vadd.f32 %v1337_v40, %v590_v11  ;;  %v659_v16 = vadd.f32 %v658_v13, %v628_v9  ;;  %v646_v9 = vmul.f32 %v1347_v43, %v1347_v43  ;;  %v647_v11 = vmul.f32 %v1323_v37, %v1323_v37 }
 0x130   : > { %v648_v13 = vmul.f32 %v1339_v41, %v1339_v41 }
 0x131   : > { %v592_v17 = vadd.f32 %v591_v14, %v1361_v46  ;;  %v660_v19 = vadd.f32 %v659_v16, %v629_v12 }
 0x133   : > { %v593_v20 = vadd.f32 %v592_v17, %v1377_v50  ;;  %v661_v24 = vadd.f32 %v660_v19, %v630_v15  ;;  %v649_v15 = vmul.f32 %v1363_v47, %v1363_v47  ;;  %v650_v17 = vmul.f32 %v1379_v51, %v1379_v51 }
 0x134   : > { %v651_v19 = vmul.f32 %v1355_v45, %v1355_v45 }
 0x135   : > { %v594_v26 = vadd.f32 %v1353_v44, %v593_v20  ;;  %v662_v30 = vadd.f32 %v661_v24, %v631_v18 }
 0x137   : > { %v595_v32 = vadd.f32 %v1369_v48, %v594_v26  ;;  %v663_v38 = vadd.f32 %v662_v30, %v632_v22 }
 0x139   : > { %v596_v36 = vadd.f32 %v595_v32, %v1267_v23  ;;  %v664_v52 = vadd.f32 %v663_v38, %v633_v28 }
 0x13b   : > { %v597_v40 = vadd.f32 %v596_v36, %v1283_v27  ;;  %v665_v54 = vadd.f32 %v664_v52, %v634_v34  ;;  %v580_v34 = vld [vmem:[#allocation4] sm:$0x1] }
 0x13d   : > { %v598_v46 = vadd.f32 %v1257_v21, %v597_v40  ;;  %v666_v56 = vadd.f32 %v665_v54, %v635_v42 }
 0x13f   : > { %v599_v50 = vadd.f32 %v1275_v25, %v598_v46  ;;  %v667_v58 = vadd.f32 %v666_v56, %v636_v53 }
 0x141   : > { %v600_v44 = vadd.f32 %v599_v50, %v1299_v31  ;;  %v668_v60 = vadd.f32 %v667_v58, %v637_v55 }
 0x143   : > { %v601_v48 = vadd.f32 %v600_v44, %v1315_v35  ;;  %v669_v62 = vadd.f32 %v668_v60, %v638_v57 }
 0x145   : > { %v602_v23 = vadd.f32 %v1291_v29, %v601_v48  ;;  %v670_v0 = vadd.f32 %v669_v62, %v639_v59 }
 0x147   : > { %v603_v27 = vadd.f32 %v1307_v33, %v602_v23  ;;  %v671_v2 = vadd.f32 %v670_v0, %v640_v61 }
 0x149   : > { %v604_v21 = vadd.f32 %v603_v27, %v1331_v39  ;;  %v672_v4 = vadd.f32 %v671_v2, %v641_v63 }
 0x14b   : > { %v605_v25 = vadd.f32 %v604_v21, %v1347_v43  ;;  %v673_v6 = vadd.f32 %v672_v4, %v642_v1 }
 0x14d   : > { %v606_v31 = vadd.f32 %v1323_v37, %v605_v25  ;;  %v674_v8 = vadd.f32 %v673_v6, %v643_v3 }
 0x14f   : > { %v607_v35 = vadd.f32 %v1339_v41, %v606_v31  ;;  %v675_v10 = vadd.f32 %v674_v8, %v644_v5  ;;  %v652_v41 = vmul.f32 %v1371_v49, %v1371_v49 }
 0x151   : > { %v608_v29 = vadd.f32 %v607_v35, %v1363_v47  ;;  %v676_v12 = vadd.f32 %v675_v10, %v645_v7 }
 0x153   : > { %v609_v33 = vadd.f32 %v608_v29, %v1379_v51  ;;  %v677_v14 = vadd.f32 %v676_v12, %v646_v9 }
 0x155   : > { %v610_v39 = vadd.f32 %v1355_v45, %v609_v33  ;;  %v678_v16 = vadd.f32 %v677_v14, %v647_v11 }
 0x157   : > { %v611_v43 = vadd.f32 %v1371_v49, %v610_v39  ;;  %v679_v18 = vadd.f32 %v678_v16, %v648_v13 }
 0x159   : > { %v612_v37 = vrot.slane %v611_v43, 4  ;;  %v680_v20 = vadd.f32 %v679_v18, %v649_v15 }
 0x15b   : > { %v613_v22 = vadd.f32 %v612_v37, %v611_v43  ;;  %v681_v24 = vadd.f32 %v680_v20, %v650_v17 }
 0x15d   : > { %v614_v26 = vrot.slane %v613_v22, 2  ;;  %v682_v28 = vadd.f32 %v681_v24, %v651_v19 }
 0x15f   : > { %v615_v47 = vadd.f32 %v614_v26, %v613_v22  ;;  %v683_v30 = vadd.f32 %v682_v28, %v652_v41 }
 0x161   : > { %v616_v32 = vrot.slane %v615_v47, 1  ;;  %v684_v38 = vrot.slane %v683_v30, 4 }
 0x163   : > { %v617_v51 = vadd.f32 %v616_v32, %v615_v47  ;;  %v685_v36 = vadd.f32 %v684_v38, %v683_v30 }
 0x165   : > { %v618_v42 = vadd.f32 %v617_v51, %v580_v34  ;;  %v686_v45 = vrot.slane %v685_v36, 2 }
 0x167   : > { %619 = vst [vmem:[#allocation4] sm:$0x1] %v618_v42  ;;  %v687_v52 = vadd.f32 %v686_v45, %v685_v36 }
 0x168   : > { %1045 = shalt.err (!%p1042_p11)
}
 0x169   : > { %s1046_s30 = scalar_lea.hbm %s1577_s3, 16 }
 0x16a   : > { %p1047_p12 = scmp.ne.s32.totalorder %s1577_s3, %s1046_s30  ;;  %p1052_p1 = scmp.lt.u32.totalorder %s1046_s30, %s1577_s3 }
 0x16c   : > { %p1048_p13 = pnand %p1047_p12, %p84_p2 }
 0x16e   : > { %p1049_p0 = pneg %p1048_p13 }
 0x170   : > { %p1054_p3 = pnand %p1052_p1, %p1049_p0 }
 0x172   : > { %1057 = shalt.err (!%p1054_p3)
}
 0x173   : > { %931 = dma.vmem_to_hbm [thread:$0]  (%p84_p2), %s721_s22, 16, %s1577_s3, [#allocation5]   ;;  %v688_v49 = vrot.slane %v687_v52, 1  ;;  %v620_v40 = vld [vmem:[#allocation6] sm:$0x1] }
 0x174   : > { %s1129_s11 = smov [#allocation6]  }
 0x175   : > { %s731_s12 = sshll.u32 %s1129_s11, 4  ;;  %v689_v53 = vadd.f32 %v688_v49, %v687_v52  ;;  %s732_s12 = int_to_ptr.vmem [resolvable:$true] %s731_s12 }
 0x176   : > { %s1058_s13 = scalar_lea.vmem %s732_s12, 16  ;;  %s1064_s14 = scalar_lea.vmem %s732_s12, 32 }
 0x177   : > { %v690_v54 = vadd.f32 %v689_v53, %v620_v40  ;;  %p1059_p5 = scmp.ne.s32.totalorder %s732_s12, %s1058_s13  ;;  %p1065_p8 = scmp.lt.s32.totalorder %s732_s12, %s732_s12 }
 0x178   : > { %p1066_p9 = scmp.lt.s32.totalorder %s1064_s14, %s1058_s13 }
 0x179   : > { %691 = vst [vmem:[#allocation6] sm:$0x1] %v690_v54  ;;  %p1060_p4 = pnand %p1059_p5, %p84_p2 }
 0x17a   : > { %p1067_p10 = por %p1066_p9, %p1065_p8 }
 0x17b   : > { %p1061_p7 = pneg %p1060_p4 }
 0x17d   : > { %p1068_p11 = pnand %p1067_p10, %p1061_p7 }
 0x17f   : > { %1071 = shalt.err (!%p1068_p11)
}
 0x180   : > { %s1072_s22 = scalar_lea.hbm %s1578_s4, 16 }
 0x181   : > { %p1073_p12 = scmp.ne.s32.totalorder %s1578_s4, %s1072_s22  ;;  %p1078_p1 = scmp.lt.u32.totalorder %s1072_s22, %s1578_s4 }
 0x183   : > { %p1074_p13 = pnand %p1073_p12, %p84_p2 }
 0x185   : > { %p1075_p0 = pneg %p1074_p13 }
 0x187   : > { %p1080_p3 = pnand %p1078_p1, %p1075_p0 }
 0x189   : > { %1083 = shalt.err (!%p1080_p3)
}
 0x18a   : > { %933 = dma.vmem_to_hbm [thread:$0]  (%p84_p2), %s732_s12, 16, %s1578_s4, [#allocation5]  }
 0x18b   : > { %1101 = dma.done.wait (%p84_p2), [#allocation5], 32  }
 0x18c   : > { %1103 = vsyncadd (%p84_p2), [#allocation5], 4294967264 }
 0x18d PF: > { %p947_p5 = scmp.ge.s32.totalorder %s1122_s18, 2  ;;  %s751_s6 = sand.u32 1, %s1110_s15  }
 0x18e   : > { %s752_s7 = scalar_lea.sflag [#allocation3], %s751_s6 }
 0x18f   : > { %p940_p4 = pnand %p947_p5, %p1199_p6 }
 0x191   : > { %1105 = dma.done.wait (!%p940_p4), %s752_s7, 4096  }
 0x192   : > { %1107 = vsyncadd (!%p940_p4), %s752_s7, 4294963200  ;;  %p16_p7 = scmp.ge.s32.totalorder %s1180_s21, 4   ;;  %s1581_s15 = smov %s1114_s16 }
 0x193   : > { %s1582_s16 = smov %s1118_s17  ;;  %s1583_s17 = smov %s1191_s24 }
 0x194   : > { %s1584_s18 = smov %s1180_s21  ;;  %18 = sbr.rel (!%p16_p7) target bundleno = 4 (0x4), region = 83 }
 0x19b   :  { %757 = vsyncpa [#allocation3], 1 }
 0x19c   :  { %759 = vsyncpa [#allocation3 + $0x1], 1 }
 0x19d   :  { %760 = vsyncpa [#allocation5], 1 }

</bundles_post_ra>
